<compile_context>
chip_gen: v7x
topology: tpu7x:2x2x1
jax: 0.10.0
libtpu: 0.0.40
codegen_flags: <defaults>
</compile_context>

<pallas_src>
import numpy as np
import jax
import jax.numpy as jnp
from jax.experimental import pallas as pl
from jax.experimental.pallas import tpu as pltpu


def _round_up(x, m):
    return ((x + m - 1) // m) * m


def _fused_gather_kernel(idx_ref, tab_ref, out_ref):
    """Fused (diseases+counts) gather for one token tile, tokens on lanes.

    idx_ref : (2, TM) int32   row 0 = disease index, row 1 = Vd + count index
    tab_ref : (I, Vp)         [tab_d @ W + b ; tab_counts]^T, vocab padded to Vp
    out_ref : (I, TM) f32     lane-dense output slab (tokens on lanes)
    """
    Vp = tab_ref.shape[1]
    TM = idx_ref.shape[1]
    iota_v = jax.lax.broadcasted_iota(jnp.int32, (Vp, TM), 0)
    d = idx_ref[0:1, :]                      # (1, TM) disease row ids
    c = idx_ref[1:2, :]                      # (1, TM) count  row ids (offset by Vd)
    # Two-hot per token (disease row + count row); disjoint since d < Vd <= c.
    # One MXU pass computes tab_d_proj[d] + tab_c[c] for the whole tile.
    two_hot = ((iota_v == d) | (iota_v == c)).astype(tab_ref.dtype)   # (Vp, TM)
    out_ref[...] = jnp.dot(tab_ref[...], two_hot,
                           preferred_element_type=jnp.float32).astype(out_ref.dtype)


def embedding_pheno_cat(d_idx, c_idx, a_idx, s_idx,
                        tab_d, tab_c, tab_a, tab_s, W, b,
                        *, tm=1024, k_align=128, mxu_dtype=jnp.float32):
    """EmbeddingPhenoCat forward.

    The diseases/counts path (the only per-token work) runs in the Pallas
    kernel; the tiny per-sample env path (age, sex) and the final concat are
    plain JAX.
    """
    B, S = d_idx.shape
    Vd, E = tab_d.shape
    Vc, I = tab_c.shape

    # --- trace-time algebraic folding (runs once, outside the hot path) -----
    # Fold Linear (+ bias) into the disease table, stack the counts table below
    # it, pad the vocab axis to an MXU/lane-friendly width, pre-transpose so
    # the kernel output is lane-dense (tokens on lanes).
    tab_d_proj = jnp.dot(tab_d.astype(jnp.float32), W.astype(jnp.float32),
                         preferred_element_type=jnp.float32) + b            # (Vd, I)
    stacked = jnp.concatenate([tab_d_proj, tab_c.astype(jnp.float32)], 0)   # (V, I)
    V = Vd + Vc
    Vp = _round_up(V, k_align)
    stacked = jnp.pad(stacked, ((0, Vp - V), (0, 0)))
    tab_t = stacked.T.astype(mxu_dtype)                                     # (I, Vp)

    # --- token rows, padded + tiled over a 'parallel' grid ------------------
    rows = B * S
    rows8 = _round_up(rows, 8)
    if rows8 <= tm:
        tm_eff, rows_pad = rows8, rows8            # single tile == full array
    else:
        tm_eff = _round_up(min(tm, rows8), 128)    # lane-dense tiles when gridded
        rows_pad = _round_up(rows, tm_eff)
    grid = (rows_pad // tm_eff,)

    idx = jnp.stack([d_idx.reshape(rows).astype(jnp.int32),
                     c_idx.reshape(rows).astype(jnp.int32) + Vd], axis=0)   # (2, rows)
    idx = jnp.pad(idx, ((0, 0), (0, rows_pad - rows)))   # pad rows discarded below

    out_t = pl.pallas_call(
        _fused_gather_kernel,
        out_shape=jax.ShapeDtypeStruct((I, rows_pad), jnp.float32),
        grid=grid,
        in_specs=[
            pl.BlockSpec((2, tm_eff), lambda i: (0, i)),   # token tile of indices
            pl.BlockSpec((I, Vp), lambda i: (0, 0)),       # table resident in VMEM
        ],
        out_specs=pl.BlockSpec((I, tm_eff), lambda i: (0, i)),
        compiler_params=pltpu.CompilerParams(
            dimension_semantics=("parallel",)),
    )(idx, tab_t)

    diseases = out_t[:, :rows].T.reshape(B, S, I)          # layout plumbing only

    # --- env path (age, sex): tiny per-sample lookups, plain JAX ------------
    env = jnp.stack([tab_a[a_idx[:, 0]], tab_s[s_idx[:, 0]]], axis=1)  # (B, 2, I)
    return jnp.concatenate([diseases, env], axis=1)                    # (B, S+2, I)


def make_sine_cosine_table(max_len, emb_size):
    pos = np.arange(max_len, dtype=np.float32)[:, None]
    div = np.exp(np.arange(0, emb_size, 2, dtype=np.float32)
                 * -(np.log(10000.0) / emb_size))
    enc = np.zeros((max_len, emb_size), dtype=np.float32)
    enc[:, 0::2] = np.sin(pos * div)
    enc[:, 1::2] = np.cos(pos * div)
    return jnp.asarray(enc)


if __name__ == "__main__":
    # sizes
    B, S = 2, 8                 # batch, diseases-sentence length
    E, I = 32, 16               # Embedding_size, instance_size
    Vd, Vc, Va, Vs = 50, 20, 100, 3

    key = jax.random.PRNGKey(0)
    k_td, k_ta, k_ts, k_w, k_b, k_di, k_ci, k_ai, k_si = jax.random.split(key, 9)

    # deterministic parameter init (matches module init schemes)
    tab_d = 0.02 * jax.random.normal(k_td, (Vd, E), jnp.float32)   # nn.Embedding normal_(0, 0.02)
    tab_c = make_sine_cosine_table(Vc, I)                          # SineCosineEncoding
    tab_a = 0.02 * jax.random.normal(k_ta, (Va, I), jnp.float32)
    tab_s = 0.02 * jax.random.normal(k_ts, (Vs, I), jnp.float32)
    bound = 1.0 / np.sqrt(E)
    W = jax.random.uniform(k_w, (E, I), jnp.float32, -bound, bound)  # projection_embed weight (in,out)
    b = jax.random.uniform(k_b, (1, I), jnp.float32, -bound, bound)  # projection_embed bias

    # deterministic example inputs (the input_dict values)
    d_idx = jax.random.randint(k_di, (B, S), 0, Vd, jnp.int32)     # input_dict['diseases']
    c_idx = jax.random.randint(k_ci, (B, S), 0, Vc, jnp.int32)     # input_dict['counts']
    a_idx = jax.random.randint(k_ai, (B, 1), 0, Va, jnp.int32)     # input_dict['age']
    s_idx = jax.random.randint(k_si, (B, 1), 0, Vs, jnp.int32)     # input_dict['sex']

    out = embedding_pheno_cat(d_idx, c_idx, a_idx, s_idx,
                              tab_d, tab_c, tab_a, tab_s, W, b)
    out = jax.block_until_ready(out)

    # pure-JAX reference of the PyTorch forward
    dis = tab_d[d_idx] @ W + b[0]                      # embed + projection_embed
    dis = dis + tab_c[c_idx]                           # + counts (Paul / SineCosine)
    env = jnp.concatenate([tab_a[a_idx[:, 0]][:, None, :],
                           tab_s[s_idx[:, 0]][:, None, :]], axis=1)
    ref = jnp.concatenate([dis, env], axis=1)

    np.testing.assert_allclose(np.asarray(out), np.asarray(ref),
                               rtol=1e-5, atol=1e-5)
    assert out.shape == (B, S + 2, I) and out.dtype == jnp.float32
    print("KERNEL_OK")
</pallas_src>

<mosaic_0001>
module attributes {stable_mosaic.version = 11 : i64} {
  func.func @_fused_gather_kernel(%arg0: i32, %arg1: memref<2x16xi32, #tpu.memory_space<vmem>>, %arg2: memref<16x128xf32, #tpu.memory_space<vmem>>, %arg3: memref<16x16xf32, #tpu.memory_space<vmem>>) attributes {dimension_semantics = [#tpu.dimension_semantics<parallel>], iteration_bounds = array<i64: 1>, scalar_prefetch = 0 : i64, scratch_operands = 0 : i64, tpu.core_type = #tpu.core_type<tc>, window_params = [{transform_indices = @transform_0, window_bounds = array<i64: 2, 16>}, {pipeline_mode = #tpu.pipeline_mode<synchronous>, transform_indices = @transform_1, window_bounds = array<i64: 16, 128>}, {transform_indices = @transform_2, window_bounds = array<i64: 16, 16>}]} {
    %0 = tpu.iota {dimensions = array<i32: 0>} : vector<128x16xi32>
    %c0 = arith.constant 0 : index
    %c0_0 = arith.constant 0 : index
    %1 = vector.load %arg1[%c0, %c0_0] : memref<2x16xi32, #tpu.memory_space<vmem>>, vector<1x16xi32>
    %c1 = arith.constant 1 : index
    %c0_1 = arith.constant 0 : index
    %2 = vector.load %arg1[%c1, %c0_1] : memref<2x16xi32, #tpu.memory_space<vmem>>, vector<1x16xi32>
    %3 = vector.broadcast %1 : vector<1x16xi32> to vector<128x16xi32>
    %4 = arith.cmpi eq, %0, %3 : vector<128x16xi32>
    %5 = vector.broadcast %2 : vector<1x16xi32> to vector<128x16xi32>
    %6 = arith.cmpi eq, %0, %5 : vector<128x16xi32>
    %7 = arith.ori %4, %6 : vector<128x16xi1>
    %8 = arith.extui %7 : vector<128x16xi1> to vector<128x16xi32>
    %9 = arith.sitofp %8 : vector<128x16xi32> to vector<128x16xf32>
    %c0_2 = arith.constant 0 : index
    %c0_3 = arith.constant 0 : index
    %10 = vector.load %arg2[%c0_2, %c0_3] : memref<16x128xf32, #tpu.memory_space<vmem>>, vector<16x128xf32>
    %cst = arith.constant dense<0.000000e+00> : vector<16x16xf32>
    %11 = tpu.matmul %10, %9, %cst {dimension_numbers = #tpu.dot_dimension_numbers<[1], [0], [0], [1], [0, 0, 1, 1], [], []>} : vector<16x128xf32>, vector<128x16xf32>, vector<16x16xf32> -> vector<16x16xf32>
    %c0_4 = arith.constant 0 : index
    %c0_5 = arith.constant 0 : index
    %12 = vector.load %arg3[%c0_4, %c0_5] : memref<16x16xf32, #tpu.memory_space<vmem>>, vector<16x16xf32>
    tpu.vector_store %arg3[%c0_4, %c0_5], %11 {strides = array<i32>} : memref<16x16xf32, #tpu.memory_space<vmem>>, vector<16x16xf32>,
    return
  }
  func.func @transform_0(%arg0: i32) -> (i32, i32) {
    %c0_i32 = arith.constant 0 : i32
    %c0_i32_0 = arith.constant 0 : i32
    return %c0_i32, %arg0 : i32, i32
  }
  func.func @transform_1(%arg0: i32) -> (i32, i32) {
    %c0_i32 = arith.constant 0 : i32
    %c0_i32_0 = arith.constant 0 : i32
    %c0_i32_1 = arith.constant 0 : i32
    return %c0_i32, %c0_i32_0 : i32, i32
  }
  func.func @transform_2(%arg0: i32) -> (i32, i32) {
    %c0_i32 = arith.constant 0 : i32
    %c0_i32_0 = arith.constant 0 : i32
    return %c0_i32, %arg0 : i32, i32
  }
}

</mosaic_0001>

<bundles_post_ra>
// kernel: tpu_custom_call.1
= control target key start
LH: loop header
LB: loop body
LE: loop exit
PB: predicated region body
PF: predicated region fallthrough
CT: control target
= control target key end

     0   :  { %7 = vsyncpa [#allocation3], 0  ;;  %s661_s0 = inlined_call_operand.hbm [shape: s32[2,16], index: 0, kind: input, shape index: {}]   ;;  %s662_s1 = inlined_call_operand.hbm [shape: f32[16,128], index: 1, kind: input, shape index: {}]   ;;  %s663_s2 = inlined_call_operand.hbm [shape: f32[16,16], index: 2, kind: output, shape index: {}]  }
   0x1   :  { %8 = vsyncpa [#allocation6], 0 }
   0x2   :  { %9 = vsyncpa [#allocation4], 0  ;;  %s440_s9 = smov [#allocation2]   ;;  %s441_s11 = smov [#allocation5]  }
   0x3   :  { %s16_s10 = sshll.u32 %s440_s9, 4  ;;  %s25_s12 = sshll.u32 %s441_s11, 4  ;;  %s17_s10 = int_to_ptr.vmem [resolvable:$true] %s16_s10  ;;  %s461_s12 = int_to_ptr.vmem [resolvable:$true] %s25_s12 }
   0x4   :  { %s368_s15 = scalar_lea.hbm %s661_s0, 32 }
   0x5   :  { %p369_p0 = scmp.ne.s32.totalorder %s661_s0, %s368_s15  ;;  %p372_p1 = scmp.lt.u32.totalorder %s368_s15, %s661_s0 }
   0x7   :  { %p374_p2 = pnand %p372_p1, %p369_p0 }
   0x9   :  { %377 = shalt.err (!%p374_p2)
}
   0xa   :  { %s378_s20 = scalar_lea.vmem %s17_s10, 32  ;;  %p383_p4 = scmp.lt.s32.totalorder %s17_s10, %s17_s10 }
   0xb   :  { %p379_p3 = scmp.ne.s32.totalorder %s17_s10, %s378_s20  ;;  %p384_p5 = scmp.lt.s32.totalorder %s378_s20, %s378_s20 }
   0xd   :  { %p385_p6 = por %p384_p5, %p383_p4 }
   0xf   :  { %p386_p7 = pnand %p385_p6, %p379_p3 }
  0x11   :  { %389 = shalt.err (!%p386_p7)
}
  0x12   :  { %19 = dma.hbm_to_vmem [thread:$0]  %s661_s0, 32, %s17_s10, [#allocation3]  }
  0x13   :  { %s390_s25 = scalar_lea.hbm %s662_s1, 256 }
  0x14   :  { %p391_p8 = scmp.ne.s32.totalorder %s662_s1, %s390_s25  ;;  %p394_p9 = scmp.lt.u32.totalorder %s390_s25, %s662_s1 }
  0x16   :  { %p396_p10 = pnand %p394_p9, %p391_p8 }
  0x18   :  { %399 = shalt.err (!%p396_p10)
}
  0x19   :  { %s400_s30 = scalar_lea.vmem %s461_s12, 256  ;;  %p405_p12 = scmp.lt.s32.totalorder %s461_s12, %s461_s12 }
  0x1a   :  { %p401_p11 = scmp.ne.s32.totalorder %s461_s12, %s400_s30  ;;  %p406_p13 = scmp.lt.s32.totalorder %s400_s30, %s400_s30 }
  0x1c   :  { %p407_p0 = por %p406_p13, %p405_p12 }
  0x1e   :  { %p408_p1 = pnand %p407_p0, %p401_p11 }
  0x20   :  { %411 = shalt.err (!%p408_p1)
}
  0x21   :  { %s442_s0 = smov 128   ;;  %s443_s3 = smov 8  }
  0x22   :  { %31 = dma.hbm_to_vmem [thread:$0]  %s662_s1, 256, %s461_s12, [#allocation6], %s442_s0, %s442_s0, %s443_s3  }
  0x23   :  { %434 = dma.done.wait [#allocation3], 32  }
  0x24   :  { %435 = vsyncadd [#allocation3], 4294967264 }
  0x25   :  { %436 = dma.done.wait [#allocation6], 256  }
  0x26   :  { %437 = vsyncadd [#allocation6], 4294967040  ;;  %v38_v0 = vlaneseq  ;;  %v500_v5 = vld [vmem:[#allocation2] ss:$0 sm:$0xff]  ;;  %v502_v6 = vld [vmem:[#allocation2 + $0x1] ss:$0 sm:$0xff] }
  0x27   :  { %v145_v8 = vld [vmem:[#allocation5] sm:$0xff]  ;;  %v444_v12 = vmov 1.0|1.0   ;;  %v146_v31 = vld [vmem:[#allocation5 + $0x8] sm:$0xff]  ;;  %s445_s1 = smov [#allocation7]  }
  0x28   :  { %v495_v1 = vshrl.u32 %v38_v0, 7  ;;  %327 = vmatprep.mubr.f32.mxu0 %v145_v8  ;;  %s230_s6 = sshll.u32 %s445_s1, 4  ;;  %s231_s6 = int_to_ptr.vmem [resolvable:$true] %s230_s6 }
  0x29   :  { %s412_s7 = scalar_lea.vmem %s231_s6, 256  ;;  %p417_p3 = scmp.lt.s32.totalorder %s231_s6, %s231_s6 }
  0x2a   :  { %v40_v2 = vadd.s32 8, %v495_v1  ;;  %v41_v3 = vadd.s32 16, %v495_v1  ;;  %v42_v4 = vadd.s32 24, %v495_v1  ;;  %v43_v7 = vadd.s32 32, %v495_v1  ;;  %p413_p2 = scmp.ne.s32.totalorder %s231_s6, %s412_s7  ;;  %p418_p4 = scmp.lt.s32.totalorder %s412_s7, %s412_s7 }
  0x2b   :  { %vm61_vm0 = vcmp.eq.s32.totalorder %v495_v1, %v500_v5  ;;  %vm81_vm2 = vcmp.eq.s32.totalorder %v495_v1, %v502_v6  ;;  %v44_v10 = vadd.s32 40, %v495_v1  ;;  %v45_v11 = vadd.s32 48, %v495_v1 }
  0x2c   :  { %vm62_vm1 = vcmp.eq.s32.totalorder %v40_v2, %v500_v5  ;;  %vm82_vm3 = vcmp.eq.s32.totalorder %v40_v2, %v502_v6  ;;  %vm511_vm4 = vmor %vm61_vm0, %vm81_vm2  ;;  %vm63_vm5 = vcmp.eq.s32.totalorder %v41_v3, %v500_v5  ;;  %vm83_vm6 = vcmp.eq.s32.totalorder %v41_v3, %v502_v6  ;;  %p419_p5 = por %p418_p4, %p417_p3 }
  0x2d   :  { %vm98_vm7 = vmor %vm62_vm1, %vm82_vm3  ;;  %vm64_vm8 = vcmp.eq.s32.totalorder %v42_v4, %v500_v5  ;;  %vm84_vm9 = vcmp.eq.s32.totalorder %v42_v4, %v502_v6  ;;  %vm65_vm12 = vcmp.eq.s32.totalorder %v43_v7, %v500_v5  ;;  %vm85_vm13 = vcmp.eq.s32.totalorder %v43_v7, %v502_v6 }
  0x2e   :  { %vm330_vm10 = vmpackc.low %vm98_vm7, %vm511_vm4  ;;  %v46_v14 = vadd.s32 56, %v495_v1  ;;  %vm66_vm15 = vcmp.eq.s32.totalorder %v44_v10, %v500_v5  ;;  %vm86_vm0 = vcmp.eq.s32.totalorder %v44_v10, %v502_v6  ;;  %v47_v15 = vadd.s32 64, %v495_v1  ;;  %p420_p6 = pnand %p419_p5, %p413_p2 }
  0x2f   :  { %331 = vmatprep.subr.msk.bf16.mxu0 %vm330_vm10, %v444_v12  ;;  %vm524_vm11 = vmor %vm63_vm5, %vm83_vm6  ;;  %vm67_vm3 = vcmp.eq.s32.totalorder %v45_v11, %v500_v5  ;;  %vm87_vm4 = vcmp.eq.s32.totalorder %v45_v11, %v502_v6  ;;  %v48_v17 = vadd.s32 72, %v495_v1  ;;  %v49_v19 = vadd.s32 80, %v495_v1 }
  0x30   :  { %333 = vmatpush3.bf16.msk.msra.mxu0 %vm330_vm10, %v444_v12  ;;  %vm100_vm14 = vmor %vm64_vm8, %vm84_vm9  ;;  %vm68_vm6 = vcmp.eq.s32.totalorder %v46_v14, %v500_v5  ;;  %vm88_vm7 = vcmp.eq.s32.totalorder %v46_v14, %v502_v6  ;;  %vm69_vm10 = vcmp.eq.s32.totalorder %v47_v15, %v500_v5  ;;  %v50_v21 = vadd.s32 88, %v495_v1 }
  0x31   :  { %vm334_vm1 = vmpackc.low %vm100_vm14, %vm524_vm11  ;;  %vm89_vm11 = vcmp.eq.s32.totalorder %v47_v15, %v502_v6  ;;  %vm90_vm14 = vcmp.eq.s32.totalorder %v48_v17, %v502_v6  ;;  %v51_v23 = vadd.s32 96, %v495_v1  ;;  %v52_v25 = vadd.s32 104, %v495_v1 }
  0x32   :  { %335 = vmatprep.subr.msk.bf16.mxu0 %vm334_vm1, %v444_v12  ;;  %vm538_vm2 = vmor %vm65_vm12, %vm85_vm13  ;;  %vm70_vm13 = vcmp.eq.s32.totalorder %v48_v17, %v500_v5  ;;  %v53_v28 = vadd.s32 112, %v495_v1  ;;  %v54_v30 = vadd.s32 120, %v495_v1 }
  0x33   :  { %vm545_vm5 = vmor %vm66_vm15, %vm86_vm0 }
  0x34   :  { %337 = vmatpush3.bf16.msk.msra.mxu0 %vm334_vm1, %v444_v12  ;;  %vm338_vm8 = vmpackc.low %vm545_vm5, %vm538_vm2  ;;  %vm71_vm1 = vcmp.eq.s32.totalorder %v49_v19, %v500_v5  ;;  %vm91_vm2 = vcmp.eq.s32.totalorder %v49_v19, %v502_v6  ;;  %vm92_vm5 = vcmp.eq.s32.totalorder %v50_v21, %v502_v6 }
  0x35   :  { %339 = vmatprep.subr.msk.bf16.mxu0 %vm338_vm8, %v444_v12  ;;  %vm558_vm9 = vmor %vm67_vm3, %vm87_vm4  ;;  %vm72_vm4 = vcmp.eq.s32.totalorder %v50_v21, %v500_v5 }
  0x36   :  { %vm565_vm12 = vmor %vm68_vm6, %vm88_vm7 }
  0x37   :  { %vm342_vm15 = vmpackc.low %vm565_vm12, %vm558_vm9 }
  0x38   :  { %341 = vmatpush3.bf16.msk.msra.mxu0 %vm338_vm8, %v444_v12  ;;  %vm577_vm0 = vmor %vm69_vm10, %vm89_vm11  ;;  %vm73_vm8 = vcmp.eq.s32.totalorder %v51_v23, %v500_v5  ;;  %vm93_vm10 = vcmp.eq.s32.totalorder %v51_v23, %v502_v6 }
  0x39   :  { %343 = vmatprep.subr.msk.bf16.mxu0 %vm342_vm15, %v444_v12  ;;  %vm590_vm3 = vmor %vm70_vm13, %vm90_vm14  ;;  %vm74_vm13 = vcmp.eq.s32.totalorder %v52_v25, %v500_v5  ;;  %vm94_vm14 = vcmp.eq.s32.totalorder %v52_v25, %v502_v6 }
  0x3a   :  { %vm346_vm6 = vmpackc.low %vm590_vm3, %vm577_vm0  ;;  %vm222_vm0 = vcmask 130048  }
  0x3b   :  { %vm600_vm7 = vmor %vm71_vm1, %vm91_vm2  ;;  %vm75_vm1 = vcmp.eq.s32.totalorder %v53_v28, %v500_v5  ;;  %vm95_vm2 = vcmp.eq.s32.totalorder %v53_v28, %v502_v6 }
  0x3c   :  { %345 = vmatpush3.bf16.msk.msra.mxu0 %vm342_vm15, %v444_v12  ;;  %vm613_vm11 = vmor %vm72_vm4, %vm92_vm5  ;;  %vm76_vm4 = vcmp.eq.s32.totalorder %v54_v30, %v500_v5  ;;  %vm96_vm5 = vcmp.eq.s32.totalorder %v54_v30, %v502_v6 }
  0x3d   :  { %347 = vmatprep.subr.msk.bf16.mxu0 %vm346_vm6, %v444_v12  ;;  %vm350_vm9 = vmpackc.low %vm613_vm11, %vm600_vm7 }
  0x3e   :  { %vm109_vm12 = vmor %vm73_vm8, %vm93_vm10 }
  0x3f   :  { %vm110_vm15 = vmor %vm74_vm13, %vm94_vm14 }
  0x40   :  { %349 = vmatpush3.bf16.msk.msra.mxu0 %vm346_vm6, %v444_v12  ;;  %vm354_vm7 = vmpackc.low %vm110_vm15, %vm109_vm12 }
  0x41   :  { %351 = vmatprep.subr.msk.bf16.mxu0 %vm350_vm9, %v444_v12  ;;  %vm111_vm8 = vmor %vm75_vm1, %vm95_vm2 }
  0x42   :  { %vm112_vm10 = vmor %vm76_vm4, %vm96_vm5 }
  0x43   :  { %vm358_vm11 = vmpackc.low %vm112_vm10, %vm111_vm8 }
  0x44   :  { %353 = vmatpush3.bf16.msk.msra.mxu0 %vm350_vm9, %v444_v12 }
  0x45   :  { %355 = vmatprep.subr.msk.bf16.mxu0 %vm354_vm7, %v444_v12 }
  0x48   :  { %357 = vmatpush3.bf16.msk.msra.mxu0 %vm354_vm7, %v444_v12 }
  0x49   :  { %359 = vmatprep.subr.msk.bf16.mxu0 %vm358_vm11, %v444_v12 }
  0x4c   :  { %361 = vmatpush3.bf16.msk.msra.mxu0 %vm358_vm11, %v444_v12 }
  0x4f   :  { %328 = vmatmul.mubr.f32.vlgmr.msra.gmra.mrb[0].mxu0 %v146_v31 }
 0x122   :  { %v329_v32 = vpop.f32.mrb[0].mxu0 }
 0x123   :  { %224 = vst.msk [vmem:[#allocation7 + $0x8] sm:$0xff] %vm222_vm0, %v329_v32  ;;  %v213_v33 = vpop.f32.mrb[1].mxu0 }
 0x124   :  { %223 = vst.msk [vmem:[#allocation7] sm:$0xff] %vm222_vm0, %v213_v33 }
 0x125   :  { %423 = shalt.err (!%p420_p6)
}
 0x126   :  { %s424_s10 = scalar_lea.hbm %s663_s2, 256 }
 0x127   :  { %p425_p7 = scmp.ne.s32.totalorder %s663_s2, %s424_s10  ;;  %p428_p8 = scmp.lt.u32.totalorder %s424_s10, %s663_s2 }
 0x129   :  { %p430_p9 = pnand %p428_p8, %p425_p7 }
 0x12b   :  { %433 = shalt.err (!%p430_p9)
}
 0x12c   :  { %236 = dma.vmem_to_hbm [thread:$0]  %s231_s6, 256, %s663_s2, [#allocation4], %s442_s0, %s442_s0, %s443_s3  }
 0x12d   :  { %438 = dma.done.wait [#allocation4], 256  }
 0x12e   :  { %439 = vsyncadd [#allocation4], 4294967040 }
 0x12f   :  { %240 = vsyncpa [#allocation3], 1 }
 0x130   :  { %241 = vsyncpa [#allocation6], 1 }
 0x131   :  { %242 = vsyncpa [#allocation4], 1 }

</bundles_post_ra>
